<compile_context>
chip_gen: v7x
topology: tpu7x:2x2x1
jax: 0.10.0
libtpu: 0.0.40
codegen_flags: <defaults>
</compile_context>

<pallas_src>
import functools
import math

import jax
import jax.numpy as jnp
from jax.experimental import pallas as pl
from jax.experimental.pallas import tpu as pltpu


def _round_down(x, m):
    return (x // m) * m


def _vmem_capacity_bytes():
    """Physical VMEM per TensorCore (64 MiB on v7x, 128 MiB on v5e/v6e)."""
    try:
        cap = getattr(pltpu.get_tpu_info(), "vmem_capacity_bytes", None)
        if cap:
            return int(cap)
    except Exception:
        pass
    return 64 << 20  # conservative floor (v7x)


def sine_layer_kernel(x_ref, w_ref, b_ref, o_ref, *, omega_0):
    # x_ref: (tm, IN)   w_ref: (IN, tn)   b_ref: (1, tn)   o_ref: (tm, tn)
    z = jnp.dot(x_ref[...], w_ref[...], preferred_element_type=jnp.float32)
    z = z + b_ref[...]                 # (1, tn) broadcast over rows, f32
    if omega_0 != 1.0:                 # skipped when omega_0 is folded in params
        z = omega_0 * z
    # Keep the epilogue in f32 (required on v5e; protects sin range reduction).
    o_ref[...] = jnp.sin(z).astype(o_ref.dtype)


def _select_tiles(B, IN, OUT, x_bytes, w_bytes, out_bytes, sub, tm_max, budget):
    """Pick (tm, tn) so the double-buffered footprint stays within `budget`."""
    def w_cost(tn):  # W + bias blocks, double-buffered
        return 2 * IN * tn * w_bytes + 2 * 8 * tn * 4

    # Out-feature tile: whole OUT if W fits half the budget -> x read once.
    if OUT <= 128 or w_cost(OUT) <= budget // 2:
        tn = OUT
    else:
        cols = (budget // 2) // (2 * IN * w_bytes + 2 * 8 * 4)
        tn = max(128, _round_down(min(cols, OUT), 128))

    # Batch tile: biggest sublane-aligned tile that fits what is left
    # (2x x-tile + 2x out-tile + f32 MXU result per row).
    per_row = 2 * IN * x_bytes + 2 * tn * out_bytes + tn * 4
    rem = max(budget - w_cost(tn), per_row * sub)
    tm = min(tm_max, rem // per_row)
    tm = max(_round_down(tm, sub), sub)
    if B <= tm:
        tm = B  # single full-dim batch block: exempt from the (8,128) rule
    return tm, tn


def sine_layer(x, w_t, b, omega_0=1.0, *, tm_max=1024,
               compute_dtype=jnp.bfloat16, out_dtype=None):
    """SIREN sine layer forward: sin(omega_0 * (x @ W^T + b)).

    x:   [B, IN]
    w_t: [IN, OUT]  PyTorch weight transposed. If omega_0 has been pre-folded
                    into (w_t, b), pass omega_0=1.0 (do NOT also pass omega_0,
                    or the scale is applied twice).
    b:   [OUT]
    compute_dtype: dtype x / W are streamed in (bf16 default halves HBM read
                   traffic; MXU accumulates f32 regardless). None = keep dtype.
    out_dtype:     output dtype (None -> x's original dtype).
    """
    B, IN = x.shape
    IN_w, OUT = w_t.shape
    assert IN == IN_w and b.shape == (OUT,)

    if out_dtype is None:
        out_dtype = x.dtype
    if compute_dtype is not None:
        x = x.astype(compute_dtype)
        w_t = w_t.astype(compute_dtype)
    b2d = b.astype(jnp.float32).reshape(1, OUT)   # bias stays f32

    x_bytes = jnp.dtype(x.dtype).itemsize
    w_bytes = jnp.dtype(w_t.dtype).itemsize
    out_bytes = jnp.dtype(out_dtype).itemsize
    # Sublane granule from both streamed and stored dtypes (bf16 needs 16).
    sub = 16 if (x_bytes < 4 or out_bytes < 4) else 8

    capacity = _vmem_capacity_bytes()
    budget = min(capacity // 3, 40 << 20)   # per-generation tile budget
    tm, tn = _select_tiles(B, IN, OUT, x_bytes, w_bytes, out_bytes,
                           sub, tm_max, budget)

    nj = pl.cdiv(OUT, tn)
    ni = pl.cdiv(B, tm)
    # Out-feature tiles outer, batch tiles inner (fastest): W / bias block index
    # is constant across the inner axis so they stay resident in VMEM.  In the
    # default configuration nj == 1, so x is streamed from HBM exactly once.
    grid = (nj, ni)

    footprint = (2 * tm * IN * x_bytes + 2 * tm * tn * out_bytes
                 + 2 * IN * tn * w_bytes + 2 * 8 * tn * 4 + tm * tn * 4)
    vmem_limit = int(min(capacity * 17 // 20,
                         max(footprint + (4 << 20), 32 << 20)))

    cost = pl.CostEstimate(
        flops=2 * B * IN * OUT,
        transcendentals=B * OUT,
        bytes_accessed=(B * IN * x_bytes * nj + IN * OUT * w_bytes
                        + OUT * 4 + B * OUT * out_bytes))

    kernel = functools.partial(sine_layer_kernel, omega_0=float(omega_0))
    return pl.pallas_call(
        kernel,
        out_shape=jax.ShapeDtypeStruct((B, OUT), out_dtype),
        grid_spec=pltpu.PrefetchScalarGridSpec(
            num_scalar_prefetch=0,
            grid=grid,
            in_specs=[
                pl.BlockSpec((tm, IN), lambda j, i: (i, 0)),   # x tiles stream
                pl.BlockSpec((IN, tn), lambda j, i: (0, j)),   # W resident
                pl.BlockSpec((1, tn), lambda j, i: (0, j)),    # bias resident
            ],
            out_specs=pl.BlockSpec((tm, tn), lambda j, i: (i, j)),
        ),
        compiler_params=pltpu.CompilerParams(
            # No reduction axis (full IN resident): both axes independent.
            # With nj == 1 the batch axis carries the v7x megacore split.
            dimension_semantics=("parallel", "parallel"),
            vmem_limit_bytes=vmem_limit,
        ),
        cost_estimate=cost,
    )(x, w_t, b2d)


def init_sine_layer_params(key, in_features, out_features, is_first=False,
                           omega_0=30.0, fold_omega=True):
    """SIREN-style init (mirrors SineLayer.init_weights). Returns (W^T, b).

    If fold_omega, omega_0 is folded into the stored params once:
    sin(omega*(x@W^T + b)) == sin(x@(omega*W^T) + omega*b), so the kernel
    epilogue needs no extra multiply (then call sine_layer with omega_0=1.0).
    """
    kw, kb = jax.random.split(key)
    if is_first:
        bound_w = 1.0 / in_features
    else:
        bound_w = math.sqrt(6.0 / in_features) / omega_0
    # PyTorch layout [out, in]; stored transposed as [in, out].
    w = jax.random.uniform(kw, (out_features, in_features), jnp.float32,
                           minval=-bound_w, maxval=bound_w)
    # nn.Linear default bias init: U(-1/sqrt(in), 1/sqrt(in))
    bound_b = 1.0 / math.sqrt(in_features)
    b = jax.random.uniform(kb, (out_features,), jnp.float32,
                           minval=-bound_b, maxval=bound_b)
    w_t = w.T
    if fold_omega:
        return omega_0 * w_t, omega_0 * b
    return w_t, b


if __name__ == "__main__":
    key = jax.random.PRNGKey(0)
    k_x, k_p, k_x3, k_p3 = jax.random.split(key, 4)

    # --- Tests 1 & 2: first SIREN layer, small shapes, omega folded in params.
    batch, in_features, out_features, omega_0 = 8, 32, 64, 30.0
    x = jax.random.uniform(k_x, (batch, in_features), jnp.float32,
                           minval=-1.0, maxval=1.0)
    w_t, b = init_sine_layer_params(k_p, in_features, out_features,
                                    is_first=True, omega_0=omega_0,
                                    fold_omega=False)
    w_t_f, b_f = omega_0 * w_t, omega_0 * b          # one-time omega fold
    ref = jnp.sin(omega_0 * (x @ w_t + b))

    # 1) f32 streaming path (tight tolerance).
    out_f32 = jax.block_until_ready(sine_layer(x, w_t_f, b_f,
                                               compute_dtype=None))
    assert out_f32.shape == (batch, out_features)
    assert jnp.allclose(out_f32, ref, atol=2e-4, rtol=2e-4), \
        float(jnp.max(jnp.abs(out_f32 - ref)))

    # 2) Default path: bf16-streamed x / W, f32 MXU accumulation, f32 output.
    out_bf16 = jax.block_until_ready(sine_layer(x, w_t_f, b_f))
    ref_bf16 = jnp.sin(
        jnp.dot(x.astype(jnp.bfloat16), w_t_f.astype(jnp.bfloat16),
                preferred_element_type=jnp.float32) + b_f)
    assert out_bf16.shape == (batch, out_features)
    assert jnp.allclose(out_bf16, ref_bf16, atol=2e-2, rtol=2e-2)

    # --- Test 3: hidden layer, ragged batch edge (B not a multiple of tm, no
    # wrapper padding), omega applied in-kernel, bf16 output write-back.
    B3, IN3, OUT3 = 300, 64, 192
    x3 = jax.random.uniform(k_x3, (B3, IN3), jnp.float32,
                            minval=-1.0, maxval=1.0)
    w3_t, b3 = init_sine_layer_params(k_p3, IN3, OUT3, is_first=False,
                                      omega_0=omega_0, fold_omega=False)
    out3 = jax.block_until_ready(
        sine_layer(x3, w3_t, b3, omega_0=omega_0, compute_dtype=None,
                   out_dtype=jnp.bfloat16, tm_max=128))
    ref3 = jnp.sin(omega_0 * (x3 @ w3_t + b3))
    assert out3.shape == (B3, OUT3)
    assert jnp.allclose(out3.astype(jnp.float32), ref3,
                        atol=1.5e-2, rtol=1e-2), \
        float(jnp.max(jnp.abs(out3.astype(jnp.float32) - ref3)))

    print("KERNEL_OK")
</pallas_src>

<mosaic_0001>
module attributes {stable_mosaic.version = 11 : i64} {
  func.func @sine_layer_kernel(%arg0: i32, %arg1: i32, %arg2: memref<8x32xf32, #tpu.memory_space<vmem>>, %arg3: memref<32x64xf32, #tpu.memory_space<vmem>>, %arg4: memref<1x64xf32, #tpu.memory_space<vmem>>, %arg5: memref<8x64xf32, #tpu.memory_space<vmem>>) attributes {dimension_semantics = [#tpu.dimension_semantics<parallel>, #tpu.dimension_semantics<parallel>], iteration_bounds = array<i64: 1, 1>, scalar_prefetch = 0 : i64, scratch_operands = 0 : i64, tpu.core_type = #tpu.core_type<tc>, window_params = [{transform_indices = @transform_0, window_bounds = array<i64: 8, 32>}, {transform_indices = @transform_1, window_bounds = array<i64: 32, 64>}, {transform_indices = @transform_2, window_bounds = array<i64: 1, 64>}, {transform_indices = @transform_3, window_bounds = array<i64: 8, 64>}]} {
    %c0 = arith.constant 0 : index
    %c0_0 = arith.constant 0 : index
    %0 = vector.load %arg2[%c0, %c0_0] : memref<8x32xf32, #tpu.memory_space<vmem>>, vector<8x32xf32>
    %c0_1 = arith.constant 0 : index
    %c0_2 = arith.constant 0 : index
    %1 = vector.load %arg3[%c0_1, %c0_2] : memref<32x64xf32, #tpu.memory_space<vmem>>, vector<32x64xf32>
    %cst = arith.constant dense<0.000000e+00> : vector<8x64xf32>
    %2 = tpu.matmul %0, %1, %cst {dimension_numbers = #tpu.dot_dimension_numbers<[1], [0], [0], [1], [0, 0, 1, 1], [], []>} : vector<8x32xf32>, vector<32x64xf32>, vector<8x64xf32> -> vector<8x64xf32>
    %c0_3 = arith.constant 0 : index
    %c0_4 = arith.constant 0 : index
    %3 = vector.load %arg4[%c0_3, %c0_4] : memref<1x64xf32, #tpu.memory_space<vmem>>, vector<1x64xf32>
    %4 = vector.broadcast %3 : vector<1x64xf32> to vector<8x64xf32>
    %5 = arith.addf %2, %4 : vector<8x64xf32>
    %6 = math.sin %5 : vector<8x64xf32>
    %c0_5 = arith.constant 0 : index
    %c0_6 = arith.constant 0 : index
    %7 = vector.load %arg5[%c0_5, %c0_6] : memref<8x64xf32, #tpu.memory_space<vmem>>, vector<8x64xf32>
    tpu.vector_store %arg5[%c0_5, %c0_6], %6 {strides = array<i32>} : memref<8x64xf32, #tpu.memory_space<vmem>>, vector<8x64xf32>,
    return
  }
  func.func @transform_0(%arg0: i32, %arg1: i32) -> (i32, i32) {
    %c0_i32 = arith.constant 0 : i32
    %c0_i32_0 = arith.constant 0 : i32
    return %arg1, %c0_i32 : i32, i32
  }
  func.func @transform_1(%arg0: i32, %arg1: i32) -> (i32, i32) {
    %c0_i32 = arith.constant 0 : i32
    %c0_i32_0 = arith.constant 0 : i32
    return %c0_i32, %arg0 : i32, i32
  }
  func.func @transform_2(%arg0: i32, %arg1: i32) -> (i32, i32) {
    %c0_i32 = arith.constant 0 : i32
    %c0_i32_0 = arith.constant 0 : i32
    return %c0_i32, %arg0 : i32, i32
  }
  func.func @transform_3(%arg0: i32, %arg1: i32) -> (i32, i32) {
    %c0_i32 = arith.constant 0 : i32
    return %arg1, %arg0 : i32, i32
  }
}

</mosaic_0001>

<bundles_post_ra>
// kernel: tpu_custom_call.1
= control target key start
LH: loop header
LB: loop body
LE: loop exit
PB: predicated region body
PF: predicated region fallthrough
CT: control target
= control target key end

     0   :  { %8 = vsyncpa [#allocation3], 0  ;;  %s472_s0 = inlined_call_operand.hbm [shape: f32[8,32], index: 0, kind: input, shape index: {}]   ;;  %s473_s1 = inlined_call_operand.hbm [shape: f32[32,64], index: 1, kind: input, shape index: {}]   ;;  %s474_s2 = inlined_call_operand.vmem [shape: f32[1,64], index: 2, kind: input, shape index: {}]   ;;  %s475_s3 = inlined_call_operand.hbm [shape: f32[8,64], index: 3, kind: output, shape index: {}]  }
   0x1   :  { %9 = vsyncpa [#allocation6], 0 }
   0x2   :  { %10 = vsyncpa [#allocation4], 0  ;;  %s371_s12 = smov [#allocation2]   ;;  %s372_s14 = smov [#allocation5]  }
   0x3   :  { %s17_s13 = sshll.u32 %s371_s12, 4  ;;  %s26_s15 = sshll.u32 %s372_s14, 4  ;;  %s18_s13 = int_to_ptr.vmem [resolvable:$true] %s17_s13  ;;  %s405_s15 = int_to_ptr.vmem [resolvable:$true] %s26_s15 }
   0x4   :  { %s299_s18 = scalar_lea.hbm %s472_s0, 128 }
   0x5   :  { %p300_p0 = scmp.ne.s32.totalorder %s472_s0, %s299_s18  ;;  %p303_p1 = scmp.lt.u32.totalorder %s299_s18, %s472_s0 }
   0x7   :  { %p305_p2 = pnand %p303_p1, %p300_p0 }
   0x9   :  { %308 = shalt.err (!%p305_p2)
}
   0xa   :  { %s309_s23 = scalar_lea.vmem %s18_s13, 128  ;;  %p314_p4 = scmp.lt.s32.totalorder %s18_s13, %s18_s13 }
   0xb   :  { %p310_p3 = scmp.ne.s32.totalorder %s18_s13, %s309_s23  ;;  %p315_p5 = scmp.lt.s32.totalorder %s309_s23, %s309_s23 }
   0xd   :  { %p316_p6 = por %p315_p5, %p314_p4 }
   0xf   :  { %p317_p7 = pnand %p316_p6, %p310_p3 }
  0x11   :  { %320 = shalt.err (!%p317_p7)
}
  0x12   :  { %20 = dma.hbm_to_vmem [thread:$0]  %s472_s0, 128, %s18_s13, [#allocation3]  }
  0x13   :  { %s321_s28 = scalar_lea.hbm %s473_s1, 512 }
  0x14   :  { %p322_p8 = scmp.ne.s32.totalorder %s473_s1, %s321_s28  ;;  %p325_p9 = scmp.lt.u32.totalorder %s321_s28, %s473_s1 }
  0x16   :  { %p327_p10 = pnand %p325_p9, %p322_p8 }
  0x18   :  { %330 = shalt.err (!%p327_p10)
}
  0x19   :  { %s331_s6 = scalar_lea.vmem %s405_s15, 512  ;;  %p336_p12 = scmp.lt.s32.totalorder %s405_s15, %s405_s15 }
  0x1a   :  { %p332_p11 = scmp.ne.s32.totalorder %s405_s15, %s331_s6  ;;  %p337_p13 = scmp.lt.s32.totalorder %s331_s6, %s331_s6 }
  0x1c   :  { %p338_p0 = por %p337_p13, %p336_p12 }
  0x1e   :  { %p339_p1 = pnand %p338_p0, %p332_p11 }
  0x20   :  { %342 = shalt.err (!%p339_p1)
}
  0x21   :  { %s373_s0 = smov 128   ;;  %s374_s7 = smov 8  }
  0x22   :  { %32 = dma.hbm_to_vmem [thread:$0]  %s473_s1, 512, %s405_s15, [#allocation6], %s373_s0, %s373_s0, %s374_s7  }
  0x23   :  { %365 = dma.done.wait [#allocation3], 128  }
  0x24   :  { %366 = vsyncadd [#allocation3], 4294967168 }
  0x25   :  { %367 = dma.done.wait [#allocation6], 512  }
  0x26   :  { %368 = vsyncadd [#allocation6], 4294966784  ;;  %v375_v0 = vmov 0.0|0.0   ;;  %vm376_vm0 = vmmov 0   ;;  %v377_v1 = vmov 0.0   ;;  %v42_v2 = vld [vmem:[#allocation5] sm:$0xff] }
  0x27   :  { %271 = vmatprep.subr.bf16.mxu0 %v375_v0  ;;  %268 = vmatprep.mubr.msk.f32.mxu0 %vm376_vm0, %v377_v1  ;;  %v43_v3 = vld [vmem:[#allocation5 + $0x8] sm:$0xff]  ;;  %v44_v4 = vld [vmem:[#allocation5 + $0x10] sm:$0xff]  ;;  %v45_v6 = vld [vmem:[#allocation5 + $0x18] sm:$0xff]  ;;  %vm53_vm1 = vcmask 261120   ;;  %v378_v23 = vmov 683565275  }
  0x28   :  { %v272_v5 = vpack.c.bf16 %v43_v3, %v42_v2  ;;  %v275_v7 = vpack.c.bf16 %v45_v6, %v44_v4  ;;  %v41_v8 = vld [vmem:[#allocation2] sm:$0xff]  ;;  %v379_v25 = vmov 2475754826   ;;  %v380_v28 = vmov 2131351028  }
  0x29   :  { %v249_v9 = vld [vmem:[%s474_s2] ss:$0 sm:$0xff]  ;;  %v381_v31 = vmov 2102212464   ;;  %v382_v34 = vmov 920167782  }
  0x2a   :  { %273 = vmatpush3.bf16.msra.mxu0 %v272_v5  ;;  %v383_v37 = vmov 1326507024   ;;  %s384_s2 = smov [#allocation7]   ;;  %vm231_vm14 = vcmask 523264  }
  0x2b   :  { %274 = vmatprep.subr.bf16.mxu0 %v375_v0  ;;  %s239_s11 = sshll.u32 %s384_s2, 4  ;;  %s240_s11 = int_to_ptr.vmem [resolvable:$true] %s239_s11 }
  0x2c   :  { %s343_s12 = scalar_lea.vmem %s240_s11, 128  ;;  %p348_p3 = scmp.lt.s32.totalorder %s240_s11, %s240_s11 }
  0x2d   :  { %p344_p2 = scmp.ne.s32.totalorder %s240_s11, %s343_s12  ;;  %p349_p4 = scmp.lt.s32.totalorder %s343_s12, %s343_s12 }
  0x2e   :  { %276 = vmatpush3.bf16.msra.mxu0 %v275_v7 }
  0x2f   :  { %p350_p5 = por %p349_p4, %p348_p3 }
  0x31   :  { %269 = vmatmul.mubr.msk.f32.vlgmr.msra.gmra.mrb[0].mxu0 %vm53_vm1, %v41_v8  ;;  %p351_p6 = pnand %p350_p5, %p344_p2 }
 0x104   :  { %v123_v10 = vpop.f32.mrb[0].mxu0 }
 0x105   :  { %v439_v11 = vadd.f32 %v249_v9, %v123_v10  ;;  %v270_v12 = vpop.f32.mrb[1].mxu0 }
 0x107   :  { %v130_v13 = vand.u32 2139095040, %v439_v11  ;;  %v127_v17 = vand.u32 2147483647, %v439_v11  ;;  %vm129_vm9 = vcmp.lt.s32.totalorder %v439_v11, 0  ;;  %vm219_vm15 = vweird.f32 %v439_v11 }
 0x109   :  { %v131_v14 = vshrl.u32 %v130_v13, 23  ;;  %v134_v20 = vand.u32 8388607, %v127_v17  ;;  %vm128_vm10 = vcmp.le.f32.partialorder %v127_v17, 0.7853982 }
 0x10b   :  { %v251_v15 = vadd.s32 4294967169, %v131_v14  ;;  %v135_v39 = vor.u32 8388608, %v134_v20 }
 0x10d   :  { %v137_v16 = vadd.s32 1, %v251_v15  ;;  %v175_v53 = vshll.u32 %v135_v39, 8 }
 0x10f   :  { %vm138_vm2 = vcmp.gt.s32.totalorder %v137_v16, 0 }
 0x110   :  { %v139_v18 = vsel %vm138_vm2, %v137_v16, 0 }
 0x111   :  { %v141_v19 = vand.u32 31, %v139_v18  ;;  %v140_v22 = vshrl.u32 %v139_v18, 5 }
 0x113   :  { %v142_v21 = vsub.s32 32, %v141_v19  ;;  %v144_v24 = vshll.u32 %v378_v23, %v141_v19  ;;  %v147_v26 = vshll.u32 %v379_v25, %v141_v19  ;;  %v150_v30 = vshll.u32 %v380_v28, %v141_v19 }
 0x114   :  { %v153_v33 = vshll.u32 %v381_v31, %v141_v19  ;;  %v156_v36 = vshll.u32 %v382_v34, %v141_v19  ;;  %vm159_vm3 = vcmp.lt.s32.totalorder %v140_v22, 1  ;;  %vm162_vm4 = vcmp.lt.s32.totalorder %v140_v22, 4 }
 0x115   :  { %v145_v27 = vshrl.u32 %v379_v25, %v142_v21  ;;  %v148_v29 = vshrl.u32 %v380_v28, %v142_v21  ;;  %v151_v32 = vshrl.u32 %v381_v31, %v142_v21  ;;  %v154_v35 = vshrl.u32 %v382_v34, %v142_v21 }
 0x116   :  { %v157_v38 = vshrl.u32 %v383_v37, %v142_v21  ;;  %v143_v48 = vshrl.u32 %v378_v23, %v142_v21  ;;  %vm161_vm5 = vcmp.lt.s32.totalorder %v140_v22, 3  ;;  %vm160_vm6 = vcmp.lt.s32.totalorder %v140_v22, 2 }
 0x117   :  { %v146_v40 = vor.u32 %v145_v27, %v144_v24  ;;  %v149_v41 = vor.u32 %v148_v29, %v147_v26  ;;  %v152_v42 = vor.u32 %v151_v32, %v150_v30  ;;  %v155_v43 = vor.u32 %v154_v35, %v153_v33 }
 0x118   :  { %v158_v44 = vor.u32 %v157_v38, %v156_v36 }
 0x119   :  { %v164_v45 = vsel %vm162_vm4, %v152_v42, 2102212464  ;;  %v167_v46 = vsel %vm159_vm3, %v146_v40, %v149_v41  ;;  %v171_v47 = vsel %vm159_vm3, %v149_v41, %v152_v42  ;;  %v168_v49 = vsel %vm162_vm4, %v155_v43, 920167782 }
 0x11a   :  { %v172_v50 = vsel %vm162_vm4, %v158_v44, 1326507024  ;;  %v169_v51 = vsel %vm161_vm5, %v152_v42, %v168_v49  ;;  %v163_v54 = vsel %vm159_vm3, %v143_v48, %v146_v40  ;;  %v165_v55 = vsel %vm161_vm5, %v149_v41, %v164_v45 }
 0x11b   :  { %v173_v52 = vsel %vm161_vm5, %v155_v43, %v172_v50  ;;  %v170_v56 = vsel %vm160_vm6, %v167_v46, %v169_v51  ;;  %v166_v62 = vsel %vm160_vm6, %v163_v54, %v165_v55 }
 0x11c   :  { %v174_v57 = vsel %vm160_vm6, %v171_v47, %v173_v52  ;;  %v448_v60 = vmul.u32.u64.low %v175_v53, %v170_v56  ;;  %v449_v61 = vmul.u32.u64.high %v175_v53, %v170_v56, %v448_v60  ;;  %v182_v0 = vmul.u32 %v175_v53, %v166_v62 }
 0x11d   :  { %v445_v58 = vmul.u32.u64.low %v175_v53, %v174_v57  ;;  %v446_v59 = vmul.u32.u64.high %v175_v53, %v174_v57, %v445_v58 }
 0x11e   :  { %v185_v63 = vadd.s32 1, %v449_v61 }
 0x11f   :  { %vm184_vm7 = vc.u32 %v446_v59, %v448_v60  ;;  %v183_v13 = vadd.s32 %v448_v60, %v446_v59 }
 0x120   :  { %v186_v1 = vsel %vm184_vm7, %v185_v63, %v449_v61 }
 0x121   :  { %v187_v2 = vadd.s32 %v186_v1, %v182_v0 }
 0x123   :  { %v188_v3 = vadd.s32 536870912, %v187_v2 }
 0x125   :  { %v189_v4 = vshrl.u32 %v188_v3, 30 }
 0x127   :  { %v190_v5 = vshll.u32 %v189_v4, 30  ;;  %v213_v26 = vsub.s32 4, %v189_v4 }
 0x129   :  { %v191_v6 = vsub.s32 %v187_v2, %v190_v5  ;;  %v214_v29 = vsel %vm129_vm9, %v213_v26, %v189_v4 }
 0x12a   :  { %v216_v31 = vsel %vm128_vm10, 0, %v214_v29 }
 0x12b   :  { %v193_v7 = vsub.s32 0, %v191_v6  ;;  %v220_v32 = vadd.s32 3, %v216_v31 }
 0x12d   :  { %v252_v8 = vmin.u32 %v193_v7, %v191_v6  ;;  %v221_v33 = vand.u32 3, %v220_v32 }
 0x12f   :  { %v195_v9 = vclz %v252_v8  ;;  %vm226_vm11 = vcmp.eq.s32.totalorder %v221_v33, 2  ;;  %vm223_vm12 = vcmp.eq.s32.totalorder %v221_v33, 0  ;;  %vm222_vm13 = vcmp.lt.s32.totalorder %v221_v33, 2 }
 0x131   :  { %v253_v10 = vadd.s32 4294967294, %v195_v9 }
 0x133   :  { %vm254_vm8 = vcmp.lt.s32.totalorder %v253_v10, 0 }
 0x134   :  { %v198_v12 = vsel %vm254_vm8, 0, %v253_v10 }
 0x135   :  { %v199_v14 = vsub.s32 32, %v198_v12  ;;  %v203_v15 = vsub.s32 4294967266, %v198_v12  ;;  %v200_v16 = vshll.u32 %v191_v6, %v198_v12 }
 0x137   :  { %v201_v18 = vshrl.u32 %v183_v13, %v199_v14  ;;  %v204_v19 = vadd.s32 127, %v203_v15 }
 0x139   :  { %v202_v20 = vor.u32 %v201_v18, %v200_v16  ;;  %v205_v21 = vshll.u32 %v204_v19, 23 }
 0x13b   :  { %v206_v22 = vor.u32 4788187, %v205_v21  ;;  %v209_v24 = vcvt.s32.f32 %v202_v20 }
 0x13d   :  { %v207_v23 = vand.u32 2147483647, %v206_v22 }
 0x13f   :  { %v210_v25 = vmul.f32 %v209_v24, %v207_v23 }
 0x141   :  { %v211_v27 = vxor.u32 2147483648, %v210_v25 }
 0x143   :  { %v212_v28 = vsel %vm129_vm9, %v211_v27, %v210_v25 }
 0x144   :  { %v215_v30 = vsel %vm128_vm10, %v439_v11, %v212_v28 }
 0x145   :  { %295 = vcosq.f32 %v215_v30 }
 0x146   :  { %297 = vsinq.f32 %v215_v30 }
 0x14f   :  { %v296_v34 = vpop.eup %295 }
 0x150   :  { %v298_v35 = vpop.eup %297  ;;  %v227_v36 = vxor.u32 2147483648, %v296_v34 }
 0x151   :  { %v224_v37 = vxor.u32 2147483648, %v298_v35 }
 0x152   :  { %v228_v38 = vsel %vm226_vm11, %v227_v36, %v298_v35 }
 0x153   :  { %v225_v17 = vsel %vm223_vm12, %v296_v34, %v224_v37 }
 0x154   :  { %v229_v39 = vsel %vm222_vm13, %v225_v17, %v228_v38 }
 0x155   :  { %v230_v40 = vsel %vm219_vm15, nan, %v229_v39 }
 0x156   :  { %232 = vst.msk [vmem:[#allocation7] sm:$0xff] %vm231_vm14, %v230_v40 }
 0x157   :  { %354 = shalt.err (!%p351_p6)
}
 0x158   :  { %s355_s15 = scalar_lea.hbm %s475_s3, 128 }
 0x159   :  { %p356_p7 = scmp.ne.s32.totalorder %s475_s3, %s355_s15  ;;  %p359_p8 = scmp.lt.u32.totalorder %s355_s15, %s475_s3 }
 0x15b   :  { %p361_p9 = pnand %p359_p8, %p356_p7 }
 0x15d   :  { %364 = shalt.err (!%p361_p9)
}
 0x15e   :  { %242 = dma.vmem_to_hbm [thread:$0]  %s240_s11, 128, %s475_s3, [#allocation4]  }
 0x15f   :  { %369 = dma.done.wait [#allocation4], 128  }
 0x160   :  { %370 = vsyncadd [#allocation4], 4294967168 }
 0x161   :  { %246 = vsyncpa [#allocation3], 1 }
 0x162   :  { %247 = vsyncpa [#allocation6], 1 }
 0x163   :  { %248 = vsyncpa [#allocation4], 1 }

</bundles_post_ra>
